<compile_context>
chip_gen: v6e
topology: v6e:2x2x1
jax: 0.10.0
libtpu: 0.0.40
codegen_flags: <defaults>
</compile_context>

<pallas_src>
import functools

import jax
import jax.numpy as jnp
from jax.experimental import pallas as pl
from jax.experimental.pallas import tpu as pltpu

LANES = 128
SUBLANES = 8
MAX_BLOCK_ROWS = 2048  # 2048 * 128 * 4B = 1 MiB per f32 input per grid step


def _dice_partial_kernel(pred_ref, mask_ref, prod_out_ref, sum_out_ref, *,
                         total_rows, block_rows):
    i = pl.program_id(0)

    p = pred_ref[...].astype(jnp.float32)
    m = mask_ref[...].astype(jnp.float32)

    if total_rows % block_rows != 0:
        # Last block hangs past the end of the array: zero the OOB rows so the
        # (undefined) padded data cannot contribute to the sums.
        row = i * block_rows + jax.lax.broadcasted_iota(
            jnp.int32, (block_rows, LANES), 0)
        valid = row < total_rows
        p = jnp.where(valid, p, 0.0)
        m = jnp.where(valid, m, 0.0)

    prod = p * m   # contributes to (pred * mask).sum()
    both = p + m   # contributes to pred.sum() + mask.sum()  (fused)

    if block_rows % SUBLANES == 0:
        # Fold the whole block down to a single (8, 128) vreg using pure VPU
        # elementwise adds — no cross-lane/XLU reduce in the steady state.
        prod = prod.reshape(-1, SUBLANES, LANES).sum(axis=0)
        both = both.reshape(-1, SUBLANES, LANES).sum(axis=0)
    # else: tiny single-block case — store the (block_rows, 128) tile as-is;
    # the wrapper-side reduce handles it (only reachable for small inputs).

    prod_out_ref[0] = prod
    sum_out_ref[0] = both


@jax.jit
def dice_loss(pred, mask):
    """Pallas TPU implementation of DiceLoss.forward(pred, mask)."""
    pred_flat = jnp.ravel(pred)
    mask_flat = jnp.ravel(mask)
    n = pred_flat.shape[0]

    # Only the lane tail (< 128 elements) ever needs padding; zeros do not
    # change any of the sums.  No full-size f32 cast here — the kernel casts
    # in-register, so we DMA the native dtype.
    rem = n % LANES
    if rem:
        pad = LANES - rem
        pred_flat = jnp.pad(pred_flat, (0, pad))
        mask_flat = jnp.pad(mask_flat, (0, pad))
        n += pad

    rows = n // LANES
    block_rows = rows if rows <= MAX_BLOCK_ROWS else MAX_BLOCK_ROWS
    acc_rows = SUBLANES if block_rows % SUBLANES == 0 else block_rows
    num_blocks = pl.cdiv(rows, block_rows)

    pred2d = pred_flat.reshape(rows, LANES)
    mask2d = mask_flat.reshape(rows, LANES)

    kernel = functools.partial(
        _dice_partial_kernel, total_rows=rows, block_rows=block_rows)

    prod_part, sum_part = pl.pallas_call(
        kernel,
        out_shape=(
            jax.ShapeDtypeStruct((num_blocks, acc_rows, LANES), jnp.float32),
            jax.ShapeDtypeStruct((num_blocks, acc_rows, LANES), jnp.float32),
        ),
        grid_spec=pltpu.PrefetchScalarGridSpec(
            num_scalar_prefetch=0,
            grid=(num_blocks,),
            in_specs=[
                pl.BlockSpec((block_rows, LANES), lambda i: (i, 0)),
                pl.BlockSpec((block_rows, LANES), lambda i: (i, 0)),
            ],
            out_specs=(
                pl.BlockSpec((1, acc_rows, LANES), lambda i: (i, 0, 0)),
                pl.BlockSpec((1, acc_rows, LANES), lambda i: (i, 0, 0)),
            ),
        ),
        compiler_params=pltpu.CompilerParams(
            dimension_semantics=("parallel",),
        ),
    )(pred2d, mask2d)

    # Final reduce over the tiny per-block partials (a few KiB) + dice formula.
    counter = jnp.sum(prod_part)
    denum = jnp.sum(sum_part) + 1e-08
    dice = 2.0 * counter / denum
    return 1.0 - dice


def dice_loss_ref(pred, mask):
    p = jnp.ravel(pred).astype(jnp.float32)
    m = jnp.ravel(mask).astype(jnp.float32)
    counter = jnp.sum(p * m)
    denum = jnp.sum(p) + jnp.sum(m) + 1e-08
    return 1.0 - 2.0 * counter / denum


if __name__ == "__main__":
    key = jax.random.PRNGKey(0)
    k_pred, k_mask = jax.random.split(key)

    # NCHW, matching a typical segmentation output: batch=2, channels=4, 16x16.
    pred = jax.nn.sigmoid(jax.random.normal(k_pred, (2, 4, 16, 16), jnp.float32))
    mask = (jax.random.uniform(k_mask, (2, 4, 16, 16)) > 0.5).astype(jnp.float32)

    loss = dice_loss(pred, mask)
    loss = jax.block_until_ready(loss)

    ref = dice_loss_ref(pred, mask)
    assert jnp.allclose(loss, ref, atol=1e-5, rtol=1e-5), (loss, ref)
    print("KERNEL_OK")
</pallas_src>

<mosaic_0001>
module attributes {stable_mosaic.version = 11 : i64} {
  func.func @_dice_partial_kernel(%arg0: i32, %arg1: memref<16x128xf32, #tpu.memory_space<vmem>>, %arg2: memref<16x128xf32, #tpu.memory_space<vmem>>, %arg3: memref<1x8x128xf32, #tpu.memory_space<vmem>>, %arg4: memref<1x8x128xf32, #tpu.memory_space<vmem>>) attributes {dimension_semantics = [#tpu.dimension_semantics<parallel>], iteration_bounds = array<i64: 1>, scalar_prefetch = 0 : i64, scratch_operands = 0 : i64, tpu.core_type = #tpu.core_type<tc>, window_params = [{transform_indices = @transform_0, window_bounds = array<i64: 16, 128>}, {transform_indices = @transform_1, window_bounds = array<i64: 16, 128>}, {transform_indices = @transform_2, window_bounds = array<i64: 1, 8, 128>}, {transform_indices = @transform_3, window_bounds = array<i64: 1, 8, 128>}]} {
    %c0 = arith.constant 0 : index
    %c0_0 = arith.constant 0 : index
    %0 = vector.load %arg1[%c0, %c0_0] : memref<16x128xf32, #tpu.memory_space<vmem>>, vector<16x128xf32>
    %c0_1 = arith.constant 0 : index
    %c0_2 = arith.constant 0 : index
    %1 = vector.load %arg2[%c0_1, %c0_2] : memref<16x128xf32, #tpu.memory_space<vmem>>, vector<16x128xf32>
    %2 = arith.mulf %0, %1 : vector<16x128xf32>
    %3 = arith.addf %0, %1 : vector<16x128xf32>
    %4 = vector.shape_cast %2 : vector<16x128xf32> to vector<2x8x128xf32>
    %cst = arith.constant dense<0.000000e+00> : vector<8x128xf32>
    %5 = vector.multi_reduction <add>, %4, %cst [0] : vector<2x8x128xf32> to vector<8x128xf32>
    %6 = vector.shape_cast %3 : vector<16x128xf32> to vector<2x8x128xf32>
    %cst_3 = arith.constant dense<0.000000e+00> : vector<8x128xf32>
    %7 = vector.multi_reduction <add>, %6, %cst_3 [0] : vector<2x8x128xf32> to vector<8x128xf32>
    %c0_4 = arith.constant 0 : index
    %c0_5 = arith.constant 0 : index
    %c0_6 = arith.constant 0 : index
    %8 = vector.load %arg3[%c0_4, %c0_5, %c0_6] : memref<1x8x128xf32, #tpu.memory_space<vmem>>, vector<1x8x128xf32>
    %9 = vector.shape_cast %8 : vector<1x8x128xf32> to vector<8x128xf32>
    %10 = vector.shape_cast %5 : vector<8x128xf32> to vector<1x8x128xf32>
    tpu.vector_store %arg3[%c0_4, %c0_5, %c0_6], %10 {strides = array<i32>} : memref<1x8x128xf32, #tpu.memory_space<vmem>>, vector<1x8x128xf32>,
    %c0_7 = arith.constant 0 : index
    %c0_8 = arith.constant 0 : index
    %c0_9 = arith.constant 0 : index
    %11 = vector.load %arg4[%c0_7, %c0_8, %c0_9] : memref<1x8x128xf32, #tpu.memory_space<vmem>>, vector<1x8x128xf32>
    %12 = vector.shape_cast %11 : vector<1x8x128xf32> to vector<8x128xf32>
    %13 = vector.shape_cast %7 : vector<8x128xf32> to vector<1x8x128xf32>
    tpu.vector_store %arg4[%c0_7, %c0_8, %c0_9], %13 {strides = array<i32>} : memref<1x8x128xf32, #tpu.memory_space<vmem>>, vector<1x8x128xf32>,
    return
  }
  func.func @transform_0(%arg0: i32) -> (i32, i32) {
    %c0_i32 = arith.constant 0 : i32
    %c0_i32_0 = arith.constant 0 : i32
    return %arg0, %c0_i32 : i32, i32
  }
  func.func @transform_1(%arg0: i32) -> (i32, i32) {
    %c0_i32 = arith.constant 0 : i32
    %c0_i32_0 = arith.constant 0 : i32
    return %arg0, %c0_i32 : i32, i32
  }
  func.func @transform_2(%arg0: i32) -> (i32, i32, i32) {
    %c0_i32 = arith.constant 0 : i32
    %c0_i32_0 = arith.constant 0 : i32
    %c0_i32_1 = arith.constant 0 : i32
    return %arg0, %c0_i32, %c0_i32_0 : i32, i32, i32
  }
  func.func @transform_3(%arg0: i32) -> (i32, i32, i32) {
    %c0_i32 = arith.constant 0 : i32
    %c0_i32_0 = arith.constant 0 : i32
    %c0_i32_1 = arith.constant 0 : i32
    return %arg0, %c0_i32, %c0_i32_0 : i32, i32, i32
  }
}

</mosaic_0001>

<bundles_post_ra>
// kernel: dice_loss.1
= control target key start
LH: loop header
LB: loop body
LE: loop exit
PB: predicated region body
PF: predicated region fallthrough
CT: control target
= control target key end

     0   :  { %s71_s0 = inlined_call_operand.vmem [shape: f32[16,128], index: 0, kind: input, shape index: {}]   ;;  %s72_s1 = inlined_call_operand.vmem [shape: f32[16,128], index: 1, kind: input, shape index: {}]   ;;  %s73_s2 = inlined_call_operand.vmem [shape: f32[1,8,128], index: 2, kind: output, shape index: {0}]   ;;  %s74_s3 = inlined_call_operand.vmem [shape: f32[1,8,128], index: 3, kind: output, shape index: {1}]  }
   0x1   :  { %v13_v0 = vld [vmem:[%s71_s0] sm:$0xff]  ;;  %v14_v1 = vld [vmem:[%s71_s0 + $0x8] sm:$0xff] }
   0x2   :  { %v15_v2 = vld [vmem:[%s72_s1] sm:$0xff]  ;;  %v16_v3 = vld [vmem:[%s72_s1 + $0x8] sm:$0xff] }
   0x3   :  { %v17_v4 = vmul.f32 %v15_v2, %v13_v0  ;;  %v19_v5 = vadd.f32 %v15_v2, %v13_v0  ;;  %v18_v6 = vmul.f32 %v16_v3, %v14_v1  ;;  %v20_v7 = vadd.f32 %v16_v3, %v14_v1 }
   0x5   :  { %v21_v8 = vadd.f32 %v18_v6, %v17_v4  ;;  %v22_v9 = vadd.f32 %v20_v7, %v19_v5 }
   0x7   :  { %23 = vst [vmem:[%s73_s2] sm:$0xff] %v21_v8  ;;  %24 = vst [vmem:[%s74_s3] sm:$0xff] %v22_v9 }

</bundles_post_ra>
